<compile_context>
chip_gen: v6e
topology: v6e:2x2x1
jax: 0.10.0
libtpu: 0.0.40
codegen_flags: <defaults>
</compile_context>

<pallas_src>
import functools

import jax
import jax.numpy as jnp
from jax.experimental import pallas as pl
from jax.experimental.pallas import tpu as pltpu


_MIN_GRID_STEPS = 8                     # keep the pipeline busy / shard across v7x's 2 TCs
_TARGET_BLOCK_BYTES = 2 * 1024 * 1024   # ~2 MiB per input block (measured sweet spot 1-4 MiB)
_NEG_FILL = -1e9                        # vocab-pad logit: exp() underflows to exactly 0.0 in f32


def _round_up(x, m):
    return (x + m - 1) // m * m


def _round_down_pos(x, m):
    return max(m, (x // m) * m)


def _sublane_multiple(dtype):
    """Row-tile alignment matching packed sublane tiling: 8 f32 / 16 bf16 / 32 int8-fp8."""
    return max(8, 32 // jnp.dtype(dtype).itemsize)


def _vmem_budget():
    """Generation-aware (vmem_limit_bytes, working budget) in bytes."""
    try:
        cap = int(getattr(pltpu.get_tpu_info(), "vmem_capacity_bytes", 64 * 1024 * 1024))
    except Exception:
        cap = 64 * 1024 * 1024
    if cap >= 100 * 1024 * 1024:        # v5e / v6e: 128 MiB physical VMEM
        limit = 96 * 1024 * 1024
    else:                               # v7x (64 MiB physical) or unknown -> conservative
        limit = int(cap * 0.58)
    budget = int(limit * 0.85)          # headroom for Mosaic internal scratch + output buffers
    return limit, budget


def _choose_tb(B_pad, V_pad, itemsizes, row_align, budget):
    """Row tile: multiple of row_align, divides B_pad, pipeline- and VMEM-friendly."""
    in_bytes_per_row = V_pad * sum(itemsizes)     # both inputs, one row, one buffer
    tmp_bytes_per_row = 4 * V_pad * 4             # ~4 live f32 (tb, V) temporaries in the body
    # (a) double-buffered inputs + temporaries must fit the working VMEM budget
    tb_vmem = _round_down_pos(budget // (2 * in_bytes_per_row + tmp_bytes_per_row), row_align)
    # (b) keep the grid >= _MIN_GRID_STEPS so DMA/compute overlap (and megacore) kick in
    tb_steps = _round_down_pos(B_pad // _MIN_GRID_STEPS, row_align)
    # (c) keep each input block near the ~1-4 MiB sweet spot
    tb_bytes = _round_down_pos(_TARGET_BLOCK_BYTES // (V_pad * max(itemsizes)), row_align)
    tb = max(row_align, min(B_pad, tb_vmem, tb_steps, tb_bytes))
    while tb > row_align and B_pad % tb:
        tb -= row_align
    return tb


def _input_buffer_count(tb, V_pad, itemsizes, budget, grid_len):
    """Use 3-deep input buffering when VMEM (and the grid length) comfortably allow it."""
    in_bytes_per_row = V_pad * sum(itemsizes)
    tmp_bytes_per_row = 4 * V_pad * 4
    if grid_len >= 3 and tb * (3 * in_bytes_per_row + tmp_bytes_per_row) <= budget:
        return 3
    return 2


def _distill_kernel(student_ref, teacher_ref, out_ref, *, inv_temp):
    """One (tb, V) tile of rows -> per-row KL contributions, shape (tb, 1)."""
    t = teacher_ref[...].astype(jnp.float32) * inv_temp
    s = student_ref[...].astype(jnp.float32) * inv_temp

    # Teacher log-sum-exp pieces (stable softmax without materializing probabilities).
    t_max = jnp.max(t, axis=-1, keepdims=True)
    t_exp = jnp.exp(t - t_max)
    t_sum = jnp.sum(t_exp, axis=-1, keepdims=True)

    # Student: only the log-sum-exp pieces are needed (no full log_q array).
    s_max = jnp.max(s, axis=-1, keepdims=True)
    s_sum = jnp.sum(jnp.exp(s - s_max), axis=-1, keepdims=True)

    # Per-row KL:
    #   sum_v p*(log p - log q)
    #     = (sum_v t_exp*(t - s)) / t_sum + (s_max - t_max) + log(s_sum / t_sum)
    # (uses sum_v p = 1; divide and log only touch (tb, 1) row vectors, no (tb, V)
    #  probability temporary.)
    weighted = jnp.sum(t_exp * (t - s), axis=-1, keepdims=True) / t_sum
    out_ref[...] = weighted + (s_max - t_max) + jnp.log(s_sum / t_sum)


def distill_loss_pallas(student_logits, teacher_logits, *, temp, gamma, tb=None):
    B, V = student_logits.shape
    assert teacher_logits.shape == (B, V), "student/teacher logits must share a shape"

    itemsizes = (jnp.dtype(student_logits.dtype).itemsize,
                 jnp.dtype(teacher_logits.dtype).itemsize)
    row_align = max(_sublane_multiple(student_logits.dtype),
                    _sublane_multiple(teacher_logits.dtype))
    vmem_limit, budget = _vmem_budget()

    # --- pad vocab to a lane multiple; padded lanes get ~-inf logits (zero softmax mass) ---
    V_pad = _round_up(V, 128)
    if V_pad != V:
        pad_v = ((0, 0), (0, V_pad - V))
        student_logits = jnp.pad(student_logits, pad_v, constant_values=_NEG_FILL)
        teacher_logits = jnp.pad(teacher_logits, pad_v, constant_values=_NEG_FILL)

    # --- pick row tile; pad batch so it divides evenly (zero rows, sliced out below) ---
    if tb is None:
        B_pad = _round_up(B, row_align)
        tb = _choose_tb(B_pad, V_pad, itemsizes, row_align, budget)
    else:
        assert tb % row_align == 0, f"tb must be a multiple of {row_align} for these dtypes"
        B_pad = _round_up(B, tb)
    if B_pad != B:
        pad_b = ((0, B_pad - B), (0, 0))
        student_logits = jnp.pad(student_logits, pad_b)
        teacher_logits = jnp.pad(teacher_logits, pad_b)
    grid_len = B_pad // tb

    nbuf = _input_buffer_count(tb, V_pad, itemsizes, budget, grid_len)
    spec_kwargs = {"pipeline_mode": pl.Buffered(nbuf)} if nbuf != 2 else {}
    in_specs = [pl.BlockSpec((tb, V_pad), lambda i: (i, 0), **spec_kwargs) for _ in range(2)]

    kernel = functools.partial(_distill_kernel, inv_temp=1.0 / float(temp))

    # TODO(synk): for vocabularies so large that even a row_align-row tile exceeds the VMEM
    # budget, add a second grid axis over V with an online log-sum-exp accumulation.
    row_losses = pl.pallas_call(
        kernel,
        out_shape=jax.ShapeDtypeStruct((B_pad, 1), jnp.float32),
        grid_spec=pltpu.PrefetchScalarGridSpec(
            num_scalar_prefetch=0,
            grid=(grid_len,),
            in_specs=in_specs,
            # Per-row (tb, 1) output stays in VMEM: its traffic (4 B/row) is <1% of the
            # input reads, so the masked narrow store is not the bottleneck here.
            out_specs=pl.BlockSpec((tb, 1), lambda i: (i, 0)),
        ),
        compiler_params=pltpu.CompilerParams(
            dimension_semantics=("parallel",),   # independent row groups -> megacore-shardable
            vmem_limit_bytes=vmem_limit,
        ),
    )(student_logits, teacher_logits)

    # batchmean + temperature^2 + gamma factors; tiny final reduce stays in XLA.
    scale = float(gamma) * float(temp) ** 2 / float(B)
    return scale * jnp.sum(row_losses[:B, 0])


def distill_loss_ref(student_logits, teacher_logits, *, temp, gamma):
    """Pure-JAX reference matching the PyTorch module."""
    log_p = jax.nn.log_softmax(teacher_logits / temp, axis=-1)
    p = jnp.exp(log_p)
    log_q = jax.nn.log_softmax(student_logits / temp, axis=-1)
    kl = jnp.sum(p * (log_p - log_q)) / student_logits.shape[0]
    return gamma * (temp ** 2) * kl


if __name__ == "__main__":
    # Module "parameters" (scalars set deterministically in __init__).
    temp = 2.0
    gamma = 0.5
    key = jax.random.PRNGKey(0)

    def check(student, teacher, *, tb=None, rtol=1e-5, atol=1e-6):
        loss = distill_loss_pallas(student, teacher, temp=temp, gamma=gamma, tb=tb)
        loss = jax.block_until_ready(loss)
        ref = distill_loss_ref(student.astype(jnp.float32), teacher.astype(jnp.float32),
                               temp=temp, gamma=gamma)
        assert jnp.allclose(loss, ref, rtol=rtol, atol=atol), (loss, ref)

    # 1) small f32 problem: auto-tiling now yields a multi-step grid (tb=8, 2 steps).
    k1, k2 = jax.random.split(key)
    check(jax.random.normal(k1, (16, 128), dtype=jnp.float32),
          jax.random.normal(k2, (16, 128), dtype=jnp.float32))

    # 2) explicit tb -> 4-step grid; exercises the 3-deep input buffering path.
    k3, k4 = jax.random.split(k1)
    check(jax.random.normal(k3, (32, 256), dtype=jnp.float32),
          jax.random.normal(k4, (32, 256), dtype=jnp.float32), tb=8)

    # 3) awkward shapes: B not a sublane multiple, V not a lane multiple (padding paths).
    k5, k6 = jax.random.split(k2)
    check(jax.random.normal(k5, (20, 200), dtype=jnp.float32),
          jax.random.normal(k6, (20, 200), dtype=jnp.float32))

    # 4) bf16 logits end-to-end through the pallas_call (halves HBM traffic).
    k7, k8 = jax.random.split(k3)
    check(jax.random.normal(k7, (64, 512)).astype(jnp.bfloat16),
          jax.random.normal(k8, (64, 512)).astype(jnp.bfloat16), rtol=1e-4)

    print("KERNEL_OK")
</pallas_src>

<mosaic_0001>
module attributes {stable_mosaic.version = 11 : i64} {
  func.func @_distill_kernel(%arg0: i32, %arg1: memref<8x128xf32, #tpu.memory_space<vmem>>, %arg2: memref<8x128xf32, #tpu.memory_space<vmem>>, %arg3: memref<8x1xf32, #tpu.memory_space<vmem>>) attributes {dimension_semantics = [#tpu.dimension_semantics<parallel>], iteration_bounds = array<i64: 2>, scalar_prefetch = 0 : i64, scratch_operands = 0 : i64, tpu.core_type = #tpu.core_type<tc>, window_params = [{transform_indices = @transform_0, window_bounds = array<i64: 8, 128>}, {transform_indices = @transform_1, window_bounds = array<i64: 8, 128>}, {transform_indices = @transform_2, window_bounds = array<i64: 8, 1>}]} {
    %c0 = arith.constant 0 : index
    %c0_0 = arith.constant 0 : index
    %0 = vector.load %arg2[%c0, %c0_0] : memref<8x128xf32, #tpu.memory_space<vmem>>, vector<8x128xf32>
    %cst = arith.constant 5.000000e-01 : f32
    %1 = vector.broadcast %cst : f32 to vector<8x128xf32>
    %2 = arith.mulf %0, %1 : vector<8x128xf32>
    %c0_1 = arith.constant 0 : index
    %c0_2 = arith.constant 0 : index
    %3 = vector.load %arg1[%c0_1, %c0_2] : memref<8x128xf32, #tpu.memory_space<vmem>>, vector<8x128xf32>
    %cst_3 = arith.constant 5.000000e-01 : f32
    %4 = vector.broadcast %cst_3 : f32 to vector<8x128xf32>
    %5 = arith.mulf %3, %4 : vector<8x128xf32>
    %cst_4 = arith.constant dense<0xFF800000> : vector<8xf32>
    %6 = vector.multi_reduction <maximumf>, %2, %cst_4 [1] : vector<8x128xf32> to vector<8xf32>
    %7 = vector.shape_cast %6 : vector<8xf32> to vector<8x1xf32>
    %8 = vector.broadcast %7 : vector<8x1xf32> to vector<8x128xf32>
    %9 = arith.subf %2, %8 : vector<8x128xf32>
    %10 = math.exp %9 : vector<8x128xf32>
    %cst_5 = arith.constant dense<0.000000e+00> : vector<8xf32>
    %11 = vector.multi_reduction <add>, %10, %cst_5 [1] : vector<8x128xf32> to vector<8xf32>
    %12 = vector.shape_cast %11 : vector<8xf32> to vector<8x1xf32>
    %cst_6 = arith.constant dense<0xFF800000> : vector<8xf32>
    %13 = vector.multi_reduction <maximumf>, %5, %cst_6 [1] : vector<8x128xf32> to vector<8xf32>
    %14 = vector.shape_cast %13 : vector<8xf32> to vector<8x1xf32>
    %15 = vector.broadcast %14 : vector<8x1xf32> to vector<8x128xf32>
    %16 = arith.subf %5, %15 : vector<8x128xf32>
    %17 = math.exp %16 : vector<8x128xf32>
    %cst_7 = arith.constant dense<0.000000e+00> : vector<8xf32>
    %18 = vector.multi_reduction <add>, %17, %cst_7 [1] : vector<8x128xf32> to vector<8xf32>
    %19 = vector.shape_cast %18 : vector<8xf32> to vector<8x1xf32>
    %20 = arith.subf %2, %5 : vector<8x128xf32>
    %21 = arith.mulf %10, %20 : vector<8x128xf32>
    %cst_8 = arith.constant dense<0.000000e+00> : vector<8xf32>
    %22 = vector.multi_reduction <add>, %21, %cst_8 [1] : vector<8x128xf32> to vector<8xf32>
    %23 = vector.shape_cast %22 : vector<8xf32> to vector<8x1xf32>
    %24 = arith.divf %23, %12 : vector<8x1xf32>
    %25 = arith.subf %14, %7 : vector<8x1xf32>
    %26 = arith.addf %24, %25 : vector<8x1xf32>
    %27 = arith.divf %19, %12 : vector<8x1xf32>
    %28 = math.log %27 : vector<8x1xf32>
    %29 = arith.addf %26, %28 : vector<8x1xf32>
    %c0_9 = arith.constant 0 : index
    %c0_10 = arith.constant 0 : index
    %30 = vector.load %arg3[%c0_9, %c0_10] : memref<8x1xf32, #tpu.memory_space<vmem>>, vector<8x1xf32>
    tpu.vector_store %arg3[%c0_9, %c0_10], %29 {strides = array<i32>} : memref<8x1xf32, #tpu.memory_space<vmem>>, vector<8x1xf32>,
    return
  }
  func.func @transform_0(%arg0: i32) -> (i32, i32) {
    %c0_i32 = arith.constant 0 : i32
    %c0_i32_0 = arith.constant 0 : i32
    return %arg0, %c0_i32 : i32, i32
  }
  func.func @transform_1(%arg0: i32) -> (i32, i32) {
    %c0_i32 = arith.constant 0 : i32
    %c0_i32_0 = arith.constant 0 : i32
    return %arg0, %c0_i32 : i32, i32
  }
  func.func @transform_2(%arg0: i32) -> (i32, i32) {
    %c0_i32 = arith.constant 0 : i32
    %c0_i32_0 = arith.constant 0 : i32
    return %arg0, %c0_i32 : i32, i32
  }
}

</mosaic_0001>

<bundles_post_ra>
// kernel: tpu_custom_call.1
= control target key start
LH: loop header
LB: loop body
LE: loop exit
PB: predicated region body
PF: predicated region fallthrough
CT: control target
= control target key end

     0   :  { %7 = vsyncpa [#allocation3], 0  ;;  %s646_s0 = inlined_call_operand.hbm [shape: f32[16,128], index: 0, kind: input, shape index: {}]   ;;  %s647_s1 = inlined_call_operand.hbm [shape: f32[16,128], index: 1, kind: input, shape index: {}]   ;;  %s648_s2 = inlined_call_operand.vmem [shape: f32[16,1], index: 2, kind: output, shape index: {}]  }
   0x1   :  { %9 = vsyncpa [#allocation3 + $0x1], 0 }
   0x2   :  { %10 = vsyncpa [#allocation5], 0 }
   0x3   :  { %12 = vsyncpa [#allocation5 + $0x1], 0  ;;  %s494_s9 = smov 0   ;;  %s496_s10 = smov 0  }
   0x4   :  { %s498_s11 = smov 0   ;;  %s500_s12 = smov 0  }
   0x5 LB: > { %s513_s13 = sadd.s32 4294967295, %s475_s12   ;;  %s516_s14 = sadd.s32 1, %s475_s12   ;;  %s475_s12 = sphi %s500_s12, %s660_s12   ;;  %s471_s11 = sphi %s498_s11, %s659_s11   ;;  %s467_s10 = sphi %s496_s10, %s658_s10   ;;  %s463_s9 = sphi %s494_s9, %s657_s9  }
   0x6   : > { %s22_s15 = ssub.s32 %s475_s12, %s516_s14  ;;  %s25_s16 = sadd.s32 1, %s471_s11 }
   0x7   : > { %p23_p0 = scmp.eq.s32.totalorder %s22_s15, 0  ;;  %p32_p1 = scmp.ne.s32.totalorder %s471_s11, %s467_s10 }
   0x8   : > { %p33_p2 = scmp.eq.s32.totalorder %s475_s12, 0  ;;  %p38_p3 = scmp.ne.s32.totalorder %s467_s10, %s463_s9 }
   0x9   : > { %s526_s17 = scalar_select %p23_p0, %s471_s11, %s25_s16  }
   0xa   : > { %p34_p4 = por %p33_p2, %p32_p1  ;;  %p39_p5 = scmp.eq.s32.totalorder %s513_s13, 0 }
   0xb   : > { %p340_p6 = scmp.lt.s32.totalorder %s475_s12, 2  ;;  %s535_s19 = sand.u32 1, %s471_s11  }
   0xc   : > { %p530_p7 = por %p39_p5, %p38_p3  ;;  %s319_s20 = sshll.u32 %s535_s19, 3 }
   0xd   : > { %s320_s21 = sshll.u32 %s475_s12, 7  ;;  %s118_s25 = scalar_lea.vmem [#allocation2], %s319_s20 }
   0xe   : > { %s650_s18 = scalar_select %p530_p7, 1, 0 }
   0xf   : > { %s544_s24 = scalar_lea.hbm %s646_s0, %s320_s21  ;;  %s125_s26 = sshll.u32 %s118_s25, 4  ;;  %s548_s26 = int_to_ptr.vmem [resolvable:$true] %s125_s26 }
  0x10   : > { %p550_p8 = pnand %p340_p6, %p34_p4  ;;  %s115_s28 = scalar_lea.sflag [#allocation3], %s535_s19 }
  0x11   : > { %s381_s29 = scalar_lea.hbm %s544_s24, 128  ;;  %s386_s4 = scalar_lea.hbm %s646_s0, 256 }
  0x12   : > { %p382_p11 = scmp.ne.s32.totalorder %s544_s24, %s381_s29  ;;  %p383_p12 = pneg %p550_p8 }
  0x13   : > { %p387_p1 = scmp.lt.s32.totalorder %s544_s24, %s646_s0  ;;  %p388_p2 = scmp.lt.s32.totalorder %s386_s4, %s381_s29 }
  0x14   : > { %p384_p13 = pnand %p383_p12, %p382_p11 }
  0x15   : > { %p389_p3 = por %p388_p2, %p387_p1 }
  0x16   : > { %p385_p0 = pneg %p384_p13 }
  0x18   : > { %p390_p4 = pnand %p389_p3, %p385_p0 }
  0x1a   : > { %393 = shalt.err (!%p390_p4)
}
  0x1b   : > { %s394_s7 = scalar_lea.vmem %s548_s26, 128  ;;  %s477_s8 = smov [#allocation2]  }
  0x1c   : > { %p395_p5 = scmp.ne.s32.totalorder %s548_s26, %s394_s7  ;;  %s399_s9 = sshll.u32 %s477_s8, 4  ;;  %s400_s9 = int_to_ptr.vmem [resolvable:$false] %s399_s9 }
  0x1d   : > { %s401_s15 = scalar_lea.vmem %s400_s9, 256  ;;  %p402_p13 = scmp.lt.s32.totalorder %s548_s26, %s400_s9 }
  0x1e   : > { %p397_p6 = pnand %p395_p5, %p383_p12  ;;  %p403_p9 = scmp.lt.s32.totalorder %s401_s15, %s394_s7 }
  0x20   : > { %p398_p11 = pneg %p397_p6  ;;  %p404_p10 = por %p403_p9, %p402_p13 }
  0x22   : > { %p405_p1 = pnand %p404_p10, %p398_p11 }
  0x24   : > { %408 = shalt.err (!%p405_p1)
}
  0x25   : > { %336 = dma.hbm_to_vmem [thread:$0]  (!%p550_p8), %s544_s24, 128, %s548_s26, %s115_s28  }
  0x26   : > { %p652_p0 = scmp.lt.s32.totalorder %s475_s12, 3  ;;  %p653_p2 = scmp.ge.s32.totalorder %s475_s12, 1 }
  0x27   : > { %s594_s25 = scalar_lea.hbm %s647_s1, %s320_s21  ;;  %s136_s29 = scalar_lea.vmem [#allocation4], %s319_s20 }
  0x28   : > { %p585_p3 = pnand %p653_p2, %p652_p0  ;;  %s143_s30 = sshll.u32 %s136_s29, 4  ;;  %s144_s30 = int_to_ptr.vmem [resolvable:$true] %s143_s30 }
  0x29   : > { %s133_s24 = scalar_lea.sflag [#allocation5], %s535_s19  ;;  %s409_s26 = scalar_lea.hbm %s594_s25, 128 }
  0x2a   : > { %s654_s16 = scalar_select %p585_p3, 1, 0 }
  0x2b   : > { %p410_p9 = scmp.ne.s32.totalorder %s594_s25, %s409_s26  ;;  %s414_s3 = scalar_lea.hbm %s647_s1, 256 }
  0x2c   : > { %p415_p5 = scmp.lt.s32.totalorder %s594_s25, %s647_s1  ;;  %p416_p6 = scmp.lt.s32.totalorder %s414_s3, %s409_s26 }
  0x2d   : > { %p412_p10 = pnand %p410_p9, %p383_p12 }
  0x2e   : > { %p417_p11 = por %p416_p6, %p415_p5 }
  0x2f   : > { %p413_p4 = pneg %p412_p10 }
  0x31   : > { %p418_p13 = pnand %p417_p11, %p413_p4 }
  0x33   : > { %421 = shalt.err (!%p418_p13)
}
  0x34   : > { %s422_s20 = scalar_lea.vmem %s144_s30, 128  ;;  %s478_s19 = smov [#allocation4]  }
  0x35   : > { %p423_p1 = scmp.ne.s32.totalorder %s144_s30, %s422_s20  ;;  %s427_s5 = sshll.u32 %s478_s19, 4  ;;  %s428_s5 = int_to_ptr.vmem [resolvable:$false] %s427_s5 }
  0x36   : > { %s429_s6 = scalar_lea.vmem %s428_s5, 256  ;;  %p430_p9 = scmp.lt.s32.totalorder %s144_s30, %s428_s5 }
  0x37   : > { %p425_p0 = pnand %p423_p1, %p383_p12  ;;  %p431_p10 = scmp.lt.s32.totalorder %s429_s6, %s422_s20 }
  0x39   : > { %p426_p2 = pneg %p425_p0  ;;  %p432_p7 = por %p431_p10, %p430_p9 }
  0x3b   : > { %p433_p3 = pnand %p432_p7, %p426_p2 }
  0x3d   : > { %436 = shalt.err (!%p433_p3)
}
  0x3e   : > { %339 = dma.hbm_to_vmem [thread:$0]  (!%p550_p8), %s594_s25, 128, %s144_s30, %s133_s24  }
  0x3f   : > { %p655_p4 = scmp.ne.s32.totalorder %s654_s16, 0 }
  0x40   : > { %s154_s7 = sand.u32 (!%p655_p4), 1, %s467_s10   ;;  %p656_p12 = scmp.ne.s32.totalorder (!%p655_p4), %s650_s18, 0 }
  0x41   : > { %152 = sbr.rel (%p655_p4) target bundleno = 405 (0x195), region = 28  ;;  %s324_s8 = sshll.u32 (!%p655_p4), %s154_s7, 3 }
  0x42   : > { %s155_s9 = scalar_lea.sflag (!%p655_p4), [#allocation3], %s154_s7  ;;  %s158_s15 = scalar_lea.vmem (!%p655_p4), [#allocation2], %s324_s8 }
  0x46   : > { %454 = dma.done.wait (%p656_p12), %s155_s9, 128  }
  0x47   : > { %456 = vsyncadd (%p656_p12), %s155_s9, 4294967168  ;;  %s164_s22 = scalar_lea.sflag [#allocation5], %s154_s7  ;;  %s167_s23 = scalar_lea.vmem [#allocation4], %s324_s8 }
  0x48   : > { %458 = dma.done.wait (%p656_p12), %s164_s22, 128  }
  0x49   : > { %460 = vsyncadd (%p656_p12), %s164_s22, 4294967168  ;;  %v196_v0 = vld [vmem:[%s167_s23] sm:$0xff]  ;;  %v198_v1 = vld [vmem:[%s158_s15] sm:$0xff]  ;;  %p192_p7 = scmp.lt.s32.totalorder %s513_s13, 1  ;;  %vm226_vm0 = vcmask 7168  }
  0x4a   : > { %v197_v2 = vmul.f32 0.5, %v196_v0  ;;  %v199_v3 = vmul.f32 0.5, %v198_v1 }
  0x4b   : > { %s662_s13 = smov (!%p192_p7, %s513_s13), 1 }
  0x4c   : > { %200 = vmax.xlane.f32.xlu0 %v197_v2  ;;  %v214_v10 = vsub.f32 %v197_v2, %v199_v3  ;;  %s326_s18 = sshll.u32 %s662_s13, 3 }
  0x4d   : > { %s195_s25 = scalar_lea.vmem %s648_s2, %s326_s18 }
  0x50   : > { %207 = vmax.xlane.f32.xlu0 %v199_v3 }
  0xd5   : > { %v201_v4 = vpop.xlane.xlu0 %200 }
  0xd6   : > { %v202_v5 = vsub.f32 %v197_v2, %v201_v4 }
  0xd8   : > { %v203_v6 = vmul.f32 1.442695, %v202_v5 }
  0xd9   : > { %v208_v7 = vpop.xlane.xlu0 %207 }
  0xda   : > { %373 = vpow2.f32 %v203_v6  ;;  %v209_v8 = vsub.f32 %v199_v3, %v208_v7  ;;  %v220_v20 = vsub.f32 %v208_v7, %v201_v4 }
  0xdc   : > { %v210_v9 = vmul.f32 1.442695, %v209_v8 }
  0xde   : > { %375 = vpow2.f32 %v210_v9 }
  0xe7   : > { %v374_v11 = vpop.eup %373 }
  0xe8   : > { %205 = vadd.xlane.f32.xlu1 %v374_v11  ;;  %v215_v12 = vmul.f32 %v374_v11, %v214_v10 }
  0xea   : > { %216 = vadd.xlane.f32.xlu0 %v215_v12 }
  0xeb   : > { %v376_v13 = vpop.eup %375 }
  0xec   : > { %212 = vadd.xlane.f32.xlu1 %v376_v13 }
 0x171   : > { %v206_v14 = vpop.xlane.xlu1 %205 }
 0x172   : > { %377 = vrcp.f32 %v206_v14 }
 0x173   : > { %v217_v18 = vpop.xlane.xlu0 %216 }
 0x175   : > { %v213_v15 = vpop.xlane.xlu1 %212 }
 0x17f   : > { %v378_v16 = vpop.eup %377 }
 0x180   : > { %v222_v17 = vmul.f32 %v378_v16, %v213_v15  ;;  %v219_v19 = vmul.f32 %v378_v16, %v217_v18 }
 0x182   : > { %379 = vlog2.f32 %v222_v17  ;;  %v221_v22 = vadd.f32 %v220_v20, %v219_v19 }
 0x18f   : > { %v380_v21 = vpop.eup %379 }
 0x190   : > { %v224_v23 = vmul.f32 0.6931472, %v380_v21 }
 0x192   : > { %v225_v24 = vadd.f32 %v224_v23, %v221_v22 }
 0x194   : > { %227 = vst.msk [vmem:[%s195_s25] sm:$0xff] %vm226_vm0, %v225_v24 }
 0x195 PF: > { %p15_p8 = scmp.ge.s32.totalorder %s516_s14, 4   ;;  %s657_s9 = smov %s467_s10 }
 0x196   : > { %s658_s10 = smov %s471_s11  ;;  %s659_s11 = smov %s526_s17 }
 0x197   : > { %s660_s12 = smov %s516_s14  ;;  %17 = sbr.rel (!%p15_p8) target bundleno = 5 (0x5), region = 81 }
 0x19c   :  { %247 = vsyncpa [#allocation3], 1 }
 0x19d   :  { %249 = vsyncpa [#allocation3 + $0x1], 1 }
 0x19e   :  { %250 = vsyncpa [#allocation5], 1 }
 0x19f   :  { %252 = vsyncpa [#allocation5 + $0x1], 1 }

</bundles_post_ra>
